<compile_context>
chip_gen: v7x
topology: tpu7x:2x2x1
jax: 0.10.0
libtpu: 0.0.40
codegen_flags: <defaults>
</compile_context>

<pallas_src>
import numpy as np
import jax
import jax.numpy as jnp
from jax.experimental import pallas as pl
from jax.experimental.pallas import tpu as pltpu

_LANE = 128
_SUBLANE = 8


def _round_up(x, m):
    return ((x + m - 1) // m) * m


def _generator_kernel(c_ref, n_ref, w1c_ref, w1n_ref, b1_ref, w2_ref, b2_ref,
                      out_ref):
    """Fused MLP tile: fc1 (split over condition/noise) + LeakyReLU(0.2) + fc2."""
    # fc1: two MXU dots (== one dot on concat([condition, noise])), f32 acc.
    h = jnp.dot(c_ref[...], w1c_ref[...], preferred_element_type=jnp.float32)
    h = h + jnp.dot(n_ref[...], w1n_ref[...], preferred_element_type=jnp.float32)
    h = h + b1_ref[...]                              # (1, Hp) f32 broadcast

    # LeakyReLU(0.2): max(h, 0.2*h) is exact for slope < 1.
    h = jnp.maximum(h, 0.2 * h)

    # fc2 (bf16 operands, f32 accumulation) + bias.
    y = jnp.dot(h.astype(w2_ref.dtype), w2_ref[...],
                preferred_element_type=jnp.float32)
    y = y + b2_ref[...]                              # (1, Op) f32 broadcast

    out_ref[...] = y.astype(out_ref.dtype)


def init_params(key, condition_dim, noise_dim, hidden_dim, output_dim):
    """Deterministic init mimicking utils.weights_init (N(0, 0.02) weights,
    zero biases) for the two Linear layers.  Weights are stored pre-transposed
    as (in_features, out_features)."""
    k1, k2 = jax.random.split(key)
    cin = condition_dim + noise_dim
    return {
        "w1": 0.02 * jax.random.normal(k1, (cin, hidden_dim), jnp.float32),
        "b1": jnp.zeros((hidden_dim,), jnp.float32),
        "w2": 0.02 * jax.random.normal(k2, (hidden_dim, output_dim), jnp.float32),
        "b2": jnp.zeros((output_dim,), jnp.float32),
    }


def prepare_params(params, condition_dim, *, compute_dtype=jnp.bfloat16):
    """One-time padding/casting of the weights (do this at init, not per call).

    Pads hidden/output feature dims up to multiples of 128 (exact zeros -> no
    numeric change), casts weights to the MXU compute dtype (bf16 by default),
    keeps biases in f32, and splits fc1's weight by [condition | noise] rows so
    the kernel never needs a materialized concat of the activations.
    """
    w1, b1, w2, b2 = params["w1"], params["b1"], params["w2"], params["b2"]
    cin, hdim = w1.shape
    hdim2, odim = w2.shape
    assert hdim2 == hdim and 0 < condition_dim < cin
    hp = _round_up(hdim, _LANE)
    op = _round_up(odim, _LANE)

    w1p = jnp.pad(w1, ((0, 0), (0, hp - hdim))).astype(compute_dtype)   # (Cin, Hp)
    w2p = jnp.pad(w2, ((0, hp - hdim), (0, op - odim))).astype(compute_dtype)
    b1p = jnp.pad(b1.astype(jnp.float32), (0, hp - hdim)).reshape(1, hp)
    b2p = jnp.pad(b2.astype(jnp.float32), (0, op - odim)).reshape(1, op)

    return {
        "w1c": w1p[:condition_dim],      # (Cd, Hp)
        "w1n": w1p[condition_dim:],      # (Nd, Hp)
        "b1": b1p,                       # (1, Hp) f32
        "w2": w2p,                       # (Hp, Op)
        "b2": b2p,                       # (1, Op) f32
        "output_dim": odim,
        "compute_dtype": compute_dtype,
    }


def _pick_tm(batch, block_b):
    tm = min(_round_up(block_b, _SUBLANE), _round_up(batch, _SUBLANE))
    # Keep >= 2 batch tiles when possible so v7x's two TensorCores both get
    # work under dimension_semantics=("parallel",).
    if batch >= 2 * _SUBLANE and pl.cdiv(batch, tm) < 2:
        tm = _round_up(pl.cdiv(batch, 2), _SUBLANE)
    return tm


def _vmem_limit_bytes(tm, cd, nd, hp, op, compute_dtype):
    wb = np.dtype(compute_dtype).itemsize
    resident = (cd + nd) * hp * wb + hp * op * wb + (hp + op) * 4   # single-buffered
    streamed = 2 * tm * (cd + nd) * wb + 2 * tm * op * 4            # double-buffered
    live = tm * (hp + op) * 4                                       # h / y intermediates
    est = resident + streamed + live
    # 3x headroom, never below the 32 MiB default, never above 56 MiB (safe on
    # v7x's 64 MiB physical VMEM).
    return int(min(max(3 * est, 32 << 20), 56 << 20))


def generator_forward(condition, noise, prepared, *, block_b=256):
    """Forward pass. `prepared` comes from prepare_params()."""
    b, cd = condition.shape
    bn, nd = noise.shape
    assert b == bn
    w1c, w1n = prepared["w1c"], prepared["w1n"]
    b1, w2, b2 = prepared["b1"], prepared["w2"], prepared["b2"]
    assert w1c.shape[0] == cd and w1n.shape[0] == nd
    hp, op = w2.shape
    odim = prepared["output_dim"]
    cdt = prepared["compute_dtype"]

    # Cheap elementwise cast of the activation streams (fuses with producers);
    # no concat / batch-pad copy is materialized in HBM.
    c = condition.astype(cdt)
    n = noise.astype(cdt)

    tm = _pick_tm(b, block_b)
    grid = (pl.cdiv(b, tm),)

    def stream_spec(feat):
        return pl.BlockSpec((tm, feat), lambda i: (i, 0))

    def resident_spec(shape):
        # Constant index_map -> fetched once; single buffer halves its VMEM use.
        return pl.BlockSpec(shape, lambda i: (0, 0), pipeline_mode=pl.Buffered(1))

    out_padded = pl.pallas_call(
        _generator_kernel,
        out_shape=jax.ShapeDtypeStruct((b, op), jnp.float32),
        grid=grid,
        in_specs=[
            stream_spec(cd),                 # condition  (streamed, double-buffered)
            stream_spec(nd),                 # noise      (streamed, double-buffered)
            resident_spec((cd, hp)),         # w1c
            resident_spec((nd, hp)),         # w1n
            resident_spec((1, hp)),          # b1
            resident_spec((hp, op)),         # w2
            resident_spec((1, op)),          # b2
        ],
        out_specs=pl.BlockSpec((tm, op), lambda i: (i, 0)),   # lane-dense store
        compiler_params=pltpu.CompilerParams(
            dimension_semantics=("parallel",),
            vmem_limit_bytes=_vmem_limit_bytes(tm, cd, nd, hp, op, cdt)),
    )(c, n, w1c, w1n, b1, w2, b2)

    return out_padded[:, :odim]


def _reference(condition, noise, params):
    x = jnp.concatenate([condition, noise], axis=1)
    h = x @ params["w1"] + params["b1"]
    h = jnp.where(h > 0, h, 0.2 * h)
    return h @ params["w2"] + params["b2"]


if __name__ == "__main__":
    # Small shapes consistent with the module's forward.
    batch = 8
    condition_dim = 4
    noise_dim = 4
    hidden_dim = 32
    output_dim = 16

    key = jax.random.PRNGKey(0)
    k_c, k_n, k_p = jax.random.split(key, 3)

    condition = jax.random.normal(k_c, (batch, condition_dim), jnp.float32)
    noise = jax.random.normal(k_n, (batch, noise_dim), jnp.float32)
    params = init_params(k_p, condition_dim, noise_dim, hidden_dim, output_dim)
    prepared = prepare_params(params, condition_dim)   # one-time pad + bf16 cast

    out = generator_forward(condition, noise, prepared)
    out = jax.block_until_ready(out)

    ref = _reference(condition, noise, params)
    assert out.shape == (batch, output_dim)
    # bf16 operands with f32 accumulation -> loosened tolerance vs f32 ref.
    assert jnp.allclose(out, ref, rtol=2e-2, atol=1e-3), "mismatch vs reference"

    print("KERNEL_OK")
</pallas_src>

<mosaic_0001>
module attributes {stable_mosaic.version = 11 : i64} {
  func.func @_generator_kernel(%arg0: i32, %arg1: memref<8x4xbf16, #tpu.memory_space<vmem>>, %arg2: memref<8x4xbf16, #tpu.memory_space<vmem>>, %arg3: memref<4x128xbf16, #tpu.memory_space<vmem>>, %arg4: memref<4x128xbf16, #tpu.memory_space<vmem>>, %arg5: memref<1x128xf32, #tpu.memory_space<vmem>>, %arg6: memref<128x128xbf16, #tpu.memory_space<vmem>>, %arg7: memref<1x128xf32, #tpu.memory_space<vmem>>, %arg8: memref<8x128xf32, #tpu.memory_space<vmem>>) attributes {dimension_semantics = [#tpu.dimension_semantics<parallel>], iteration_bounds = array<i64: 1>, scalar_prefetch = 0 : i64, scratch_operands = 0 : i64, tpu.core_type = #tpu.core_type<tc>, window_params = [{transform_indices = @transform_0, window_bounds = array<i64: 8, 4>}, {transform_indices = @transform_1, window_bounds = array<i64: 8, 4>}, {pipeline_mode = #tpu.pipeline_mode<synchronous>, transform_indices = @transform_2, window_bounds = array<i64: 4, 128>}, {pipeline_mode = #tpu.pipeline_mode<synchronous>, transform_indices = @transform_3, window_bounds = array<i64: 4, 128>}, {pipeline_mode = #tpu.pipeline_mode<synchronous>, transform_indices = @transform_4, window_bounds = array<i64: 1, 128>}, {pipeline_mode = #tpu.pipeline_mode<synchronous>, transform_indices = @transform_5, window_bounds = array<i64: 128, 128>}, {pipeline_mode = #tpu.pipeline_mode<synchronous>, transform_indices = @transform_6, window_bounds = array<i64: 1, 128>}, {transform_indices = @transform_7, window_bounds = array<i64: 8, 128>}]} {
    %c0 = arith.constant 0 : index
    %c0_0 = arith.constant 0 : index
    %0 = vector.load %arg1[%c0, %c0_0] : memref<8x4xbf16, #tpu.memory_space<vmem>>, vector<8x4xbf16>
    %c0_1 = arith.constant 0 : index
    %c0_2 = arith.constant 0 : index
    %1 = vector.load %arg3[%c0_1, %c0_2] : memref<4x128xbf16, #tpu.memory_space<vmem>>, vector<4x128xbf16>
    %cst = arith.constant dense<0.000000e+00> : vector<8x128xf32>
    %2 = tpu.matmul %0, %1, %cst {dimension_numbers = #tpu.dot_dimension_numbers<[1], [0], [0], [1], [0, 0, 1, 1], [], []>} : vector<8x4xbf16>, vector<4x128xbf16>, vector<8x128xf32> -> vector<8x128xf32>
    %c0_3 = arith.constant 0 : index
    %c0_4 = arith.constant 0 : index
    %3 = vector.load %arg2[%c0_3, %c0_4] : memref<8x4xbf16, #tpu.memory_space<vmem>>, vector<8x4xbf16>
    %c0_5 = arith.constant 0 : index
    %c0_6 = arith.constant 0 : index
    %4 = vector.load %arg4[%c0_5, %c0_6] : memref<4x128xbf16, #tpu.memory_space<vmem>>, vector<4x128xbf16>
    %cst_7 = arith.constant dense<0.000000e+00> : vector<8x128xf32>
    %5 = tpu.matmul %3, %4, %cst_7 {dimension_numbers = #tpu.dot_dimension_numbers<[1], [0], [0], [1], [0, 0, 1, 1], [], []>} : vector<8x4xbf16>, vector<4x128xbf16>, vector<8x128xf32> -> vector<8x128xf32>
    %6 = arith.addf %2, %5 : vector<8x128xf32>
    %c0_8 = arith.constant 0 : index
    %c0_9 = arith.constant 0 : index
    %7 = vector.load %arg5[%c0_8, %c0_9] : memref<1x128xf32, #tpu.memory_space<vmem>>, vector<1x128xf32>
    %8 = vector.broadcast %7 : vector<1x128xf32> to vector<8x128xf32>
    %9 = arith.addf %6, %8 : vector<8x128xf32>
    %cst_10 = arith.constant 2.000000e-01 : f32
    %10 = vector.broadcast %cst_10 : f32 to vector<8x128xf32>
    %11 = arith.mulf %10, %9 : vector<8x128xf32>
    %12 = arith.maximumf %9, %11 : vector<8x128xf32>
    %13 = arith.truncf %12 : vector<8x128xf32> to vector<8x128xbf16>
    %c0_11 = arith.constant 0 : index
    %c0_12 = arith.constant 0 : index
    %14 = vector.load %arg6[%c0_11, %c0_12] : memref<128x128xbf16, #tpu.memory_space<vmem>>, vector<128x128xbf16>
    %cst_13 = arith.constant dense<0.000000e+00> : vector<8x128xf32>
    %15 = tpu.matmul %13, %14, %cst_13 {dimension_numbers = #tpu.dot_dimension_numbers<[1], [0], [0], [1], [0, 0, 1, 1], [], []>} : vector<8x128xbf16>, vector<128x128xbf16>, vector<8x128xf32> -> vector<8x128xf32>
    %c0_14 = arith.constant 0 : index
    %c0_15 = arith.constant 0 : index
    %16 = vector.load %arg7[%c0_14, %c0_15] : memref<1x128xf32, #tpu.memory_space<vmem>>, vector<1x128xf32>
    %17 = vector.broadcast %16 : vector<1x128xf32> to vector<8x128xf32>
    %18 = arith.addf %15, %17 : vector<8x128xf32>
    %c0_16 = arith.constant 0 : index
    %c0_17 = arith.constant 0 : index
    %19 = vector.load %arg8[%c0_16, %c0_17] : memref<8x128xf32, #tpu.memory_space<vmem>>, vector<8x128xf32>
    tpu.vector_store %arg8[%c0_16, %c0_17], %18 {strides = array<i32>} : memref<8x128xf32, #tpu.memory_space<vmem>>, vector<8x128xf32>,
    return
  }
  func.func @transform_0(%arg0: i32) -> (i32, i32) {
    %c0_i32 = arith.constant 0 : i32
    %c0_i32_0 = arith.constant 0 : i32
    return %arg0, %c0_i32 : i32, i32
  }
  func.func @transform_1(%arg0: i32) -> (i32, i32) {
    %c0_i32 = arith.constant 0 : i32
    %c0_i32_0 = arith.constant 0 : i32
    return %arg0, %c0_i32 : i32, i32
  }
  func.func @transform_2(%arg0: i32) -> (i32, i32) {
    %c0_i32 = arith.constant 0 : i32
    %c0_i32_0 = arith.constant 0 : i32
    %c0_i32_1 = arith.constant 0 : i32
    return %c0_i32, %c0_i32_0 : i32, i32
  }
  func.func @transform_3(%arg0: i32) -> (i32, i32) {
    %c0_i32 = arith.constant 0 : i32
    %c0_i32_0 = arith.constant 0 : i32
    %c0_i32_1 = arith.constant 0 : i32
    return %c0_i32, %c0_i32_0 : i32, i32
  }
  func.func @transform_4(%arg0: i32) -> (i32, i32) {
    %c0_i32 = arith.constant 0 : i32
    %c0_i32_0 = arith.constant 0 : i32
    %c0_i32_1 = arith.constant 0 : i32
    return %c0_i32, %c0_i32_0 : i32, i32
  }
  func.func @transform_5(%arg0: i32) -> (i32, i32) {
    %c0_i32 = arith.constant 0 : i32
    %c0_i32_0 = arith.constant 0 : i32
    %c0_i32_1 = arith.constant 0 : i32
    return %c0_i32, %c0_i32_0 : i32, i32
  }
  func.func @transform_6(%arg0: i32) -> (i32, i32) {
    %c0_i32 = arith.constant 0 : i32
    %c0_i32_0 = arith.constant 0 : i32
    %c0_i32_1 = arith.constant 0 : i32
    return %c0_i32, %c0_i32_0 : i32, i32
  }
  func.func @transform_7(%arg0: i32) -> (i32, i32) {
    %c0_i32 = arith.constant 0 : i32
    %c0_i32_0 = arith.constant 0 : i32
    return %arg0, %c0_i32 : i32, i32
  }
}

</mosaic_0001>

<bundles_post_ra>
// kernel: tpu_custom_call.1
= control target key start
LH: loop header
LB: loop body
LE: loop exit
PB: predicated region body
PF: predicated region fallthrough
CT: control target
= control target key end

     0   :  { %12 = vsyncpa [#allocation3], 0  ;;  %s488_s0 = inlined_call_operand.vmem [shape: bf16[8,4], index: 0, kind: input, shape index: {}]   ;;  %s489_s1 = inlined_call_operand.vmem [shape: bf16[8,4], index: 1, kind: input, shape index: {}]   ;;  %s490_s2 = inlined_call_operand.vmem [shape: bf16[4,128], index: 2, kind: input, shape index: {}]   ;;  %s491_s3 = inlined_call_operand.vmem [shape: bf16[4,128], index: 3, kind: input, shape index: {}]   ;;  %s492_s4 = inlined_call_operand.vmem [shape: f32[1,128], index: 4, kind: input, shape index: {}]   ;;  %s493_s5 = inlined_call_operand.hbm [shape: bf16[128,128], index: 5, kind: input, shape index: {}]   ;;  %s494_s6 = inlined_call_operand.vmem [shape: f32[1,128], index: 6, kind: input, shape index: {}]   ;;  %s495_s7 = inlined_call_operand.hbm [shape: f32[8,128], index: 7, kind: output, shape index: {}]  }
   0x1   :  { %13 = vsyncpa [#allocation4], 0  ;;  %s397_s24 = smov [#allocation2]   ;;  %s349_s28 = scalar_lea.hbm %s493_s5, 1024 }
   0x2   :  { %s29_s25 = sshll.u32 %s397_s24, 4  ;;  %p350_p0 = scmp.ne.s32.totalorder %s493_s5, %s349_s28  ;;  %s30_s25 = int_to_ptr.vmem [resolvable:$true] %s29_s25 }
   0x3   :  { %p353_p1 = scmp.lt.u32.totalorder %s349_s28, %s493_s5 }
   0x5   :  { %p355_p2 = pnand %p353_p1, %p350_p0 }
   0x7   :  { %358 = shalt.err (!%p355_p2)
}
   0x8   :  { %s359_s10 = scalar_lea.vmem %s30_s25, 1024  ;;  %p364_p4 = scmp.lt.s32.totalorder %s30_s25, %s30_s25 }
   0x9   :  { %p360_p3 = scmp.ne.s32.totalorder %s30_s25, %s359_s10  ;;  %p365_p5 = scmp.lt.s32.totalorder %s359_s10, %s359_s10 }
   0xb   :  { %p366_p6 = por %p365_p5, %p364_p4 }
   0xd   :  { %p367_p7 = pnand %p366_p6, %p360_p3 }
   0xf   :  { %370 = shalt.err (!%p367_p7)
}
  0x10   :  { %s398_s11 = smov 64   ;;  %s399_s12 = smov 4  }
  0x11   :  { %35 = dma.hbm_to_vmem [thread:$0]  %s493_s5, 1024, %s30_s25, [#allocation3], %s398_s11, %s398_s11, %s399_s12  }
  0x12   :  { %393 = dma.done.wait [#allocation3], 1024  }
  0x13   :  { %394 = vsyncadd [#allocation3], 4294966272  ;;  %v400_v0 = vmov 0.0   ;;  %vm401_vm0 = vmmov 0   ;;  %vm50_vm1 = vcmask 1041408   ;;  %vm46_vm2 = vcmask 31744  }
  0x14   :  { %303 = vmatprep.subr.bf16.mxu1 %v400_v0  ;;  %305 = vmatprep.mubr.msk.bf16.mxu1 %vm401_vm0, %v400_v0  ;;  %v43_v1 = vld [vmem:[%s490_s2] sm:$0x3]  ;;  %v341_v5 = vld [vmem:[#allocation2] sm:$0xff]   ;;  %v342_v7 = vld [vmem:[#allocation2 + $0x8] sm:$0xff]   ;;  %s402_s22 = smov [#allocation5]  }
  0x15   :  { %315 = vmatprep.subr.bf16.mxu0 %v400_v0  ;;  %331 = vmatprep.mubr.msk.bf16.mxu0 %vm401_vm0, %v400_v0  ;;  %v45_v2 = vld [vmem:[%s491_s3] sm:$0x3]  ;;  %v98_v6 = vsel %vm50_vm1, %v43_v1, 0  ;;  %v343_v8 = vld [vmem:[#allocation2 + $0x10] sm:$0xff]   ;;  %v345_v11 = vld [vmem:[#allocation2 + $0x20] sm:$0xff]   ;;  %s269_s23 = sshll.u32 %s402_s22, 4  ;;  %s270_s23 = int_to_ptr.vmem [resolvable:$true] %s269_s23 }
  0x16   :  { %v52_v3 = vsel %vm50_vm1, %v45_v2, 0  ;;  %v44_v4 = vld [vmem:[%s489_s1] sm:$0xf]  ;;  %316 = vmatpush3.bf16.msra.mxu0 %v341_v5  ;;  %v346_v12 = vld [vmem:[#allocation2 + $0x28] sm:$0xff]   ;;  %v347_v13 = vld [vmem:[#allocation2 + $0x30] sm:$0xff]   ;;  %p376_p9 = scmp.lt.s32.totalorder %s270_s23, %s270_s23 }
  0x17   :  { %304 = vmatpush3.bf16.msra.mxu1 %v52_v3  ;;  %317 = vmatprep.subr.bf16.mxu0 %v400_v0  ;;  %v42_v9 = vld [vmem:[%s488_s0] sm:$0xf] }
  0x18   :  { %309 = vmatprep.subr.bf16.mxu1 %v400_v0  ;;  %v344_v10 = vld [vmem:[#allocation2 + $0x18] sm:$0xff]  }
  0x19   :  { %v348_v14 = vld [vmem:[#allocation2 + $0x38] sm:$0xff]  }
  0x1a   :  { %306 = vmatmul.mubr.msk.bf16.vlgmr.msra.gmra.mrb[0].mxu1 %vm46_vm2, %v44_v4  ;;  %318 = vmatpush3.bf16.msra.mxu0 %v342_v7  ;;  %v280_v20 = vld [vmem:[%s492_s4] ss:$0 sm:$0xff]  ;;  %s371_s4 = scalar_lea.vmem %s270_s23, 128 }
  0x1b   :  { %310 = vmatpush3.bf16.msra.mxu1 %v98_v6  ;;  %311 = vmatprep.mubr.msk.bf16.mxu1 %vm401_vm0, %v400_v0  ;;  %v281_v29 = vld [vmem:[%s494_s6] ss:$0 sm:$0xff]  ;;  %p372_p8 = scmp.ne.s32.totalorder %s270_s23, %s371_s4  ;;  %p377_p10 = scmp.lt.s32.totalorder %s371_s4, %s371_s4 }
  0x1c   :  { %319 = vmatprep.subr.bf16.mxu0 %v400_v0 }
  0x1d   :  { %p378_p11 = por %p377_p10, %p376_p9 }
  0x1e   :  { %320 = vmatpush3.bf16.msra.mxu0 %v343_v8 }
  0x1f   :  { %321 = vmatprep.subr.bf16.mxu0 %v400_v0  ;;  %p379_p12 = pnand %p378_p11, %p372_p8 }
  0x22   :  { %312 = vmatmul.mubr.msk.bf16.vlgmr.msra.gmra.mrb[4].mxu1 %vm46_vm2, %v42_v9  ;;  %322 = vmatpush3.bf16.msra.mxu0 %v344_v10 }
  0x23   :  { %323 = vmatprep.subr.bf16.mxu0 %v400_v0 }
  0x26   :  { %324 = vmatpush3.bf16.msra.mxu0 %v345_v11 }
  0x27   :  { %325 = vmatprep.subr.bf16.mxu0 %v400_v0 }
  0x2a   :  { %326 = vmatpush3.bf16.msra.mxu0 %v346_v12 }
  0x2b   :  { %327 = vmatprep.subr.bf16.mxu0 %v400_v0 }
  0x2e   :  { %328 = vmatpush3.bf16.msra.mxu0 %v347_v13 }
  0x2f   :  { %329 = vmatprep.subr.bf16.mxu0 %v400_v0 }
  0x32   :  { %330 = vmatpush3.bf16.msra.mxu0 %v348_v14 }
  0xed   :  { %v88_v15 = vpop.f32.mrb[0].mxu1 }
  0xee   :  { %v307_v16 = vpop.f32.mrb[1].mxu1 }
  0xef   :  { %v91_v17 = vpop.f32.mrb[2].mxu1 }
  0xf0   :  { %v308_v18 = vpop.f32.mrb[3].mxu1 }
  0xf5   :  { %v134_v19 = vpop.f32.mrb[4].mxu1 }
  0xf6   :  { %v135_v21 = vadd.f32 %v134_v19, %v88_v15  ;;  %v313_v22 = vpop.f32.mrb[5].mxu1 }
  0xf7   :  { %v137_v23 = vpop.f32.mrb[6].mxu1 }
  0xf8   :  { %v147_v24 = vadd.f32 %v280_v20, %v135_v21  ;;  %v314_v25 = vpop.f32.mrb[7].mxu1 }
  0xfa   :  { %v148_v26 = vmul.f32 0.2, %v147_v24 }
  0xfc   :  { %v149_v27 = vmax.f32 %v147_v24, %v148_v26 }
  0xfe   :  { %v150_v28 = vpack.c.bf16 %v149_v27, %v149_v27 }
 0x100   :  { %332 = vmatmul.mubr.bf16.vlgmr.msra.gmra.mrb[0].mxu0 %v150_v28 }
 0x1d3   :  { %v256_v30 = vpop.f32.mrb[0].mxu0 }
 0x1d4   :  { %v257_v31 = vadd.f32 %v281_v29, %v256_v30  ;;  %v333_v32 = vpop.f32.mrb[1].mxu0 }
 0x1d5   :  { %v259_v33 = vpop.f32.mrb[2].mxu0 }
 0x1d6   :  { %262 = vst [vmem:[#allocation5] sm:$0xff] %v257_v31  ;;  %v334_v34 = vpop.f32.mrb[3].mxu0 }
 0x1d7   :  { %382 = shalt.err (!%p379_p12)
}
 0x1d8   :  { %s383_s6 = scalar_lea.hbm %s495_s7, 128 }
 0x1d9   :  { %p384_p13 = scmp.ne.s32.totalorder %s495_s7, %s383_s6  ;;  %p387_p0 = scmp.lt.u32.totalorder %s383_s6, %s495_s7 }
 0x1db   :  { %p389_p1 = pnand %p387_p0, %p384_p13 }
 0x1dd   :  { %392 = shalt.err (!%p389_p1)
}
 0x1de   :  { %272 = dma.vmem_to_hbm [thread:$0]  %s270_s23, 128, %s495_s7, [#allocation4]  }
 0x1df   :  { %395 = dma.done.wait [#allocation4], 128  }
 0x1e0   :  { %396 = vsyncadd [#allocation4], 4294967168 }
 0x1e1   :  { %276 = vsyncpa [#allocation3], 1 }
 0x1e2   :  { %277 = vsyncpa [#allocation4], 1 }

</bundles_post_ra>
